<compile_context>
chip_gen: v7x
topology: tpu7x:2x2x1
jax: 0.10.0
libtpu: 0.0.40
codegen_flags: <defaults>
</compile_context>

<pallas_src>
import jax
import jax.numpy as jnp
from jax.experimental import pallas as pl
from jax.experimental.pallas import tpu as pltpu

SUBLANES = 8      # vreg sublane depth (f32)
SMALL_B = 1024    # below this, run a single whole-array block (grid of 1)


def _round_up(n, m):
    return ((n + m - 1) // m) * m


def _linear_vpu_kernel(x_ref, wt_ref, b_ref, o_ref):
    """VPU-only linear tile: y = sum_k x[:, k] * Wt[k, :] + b.

    x_ref : (TB, IN)   batch-tile of inputs
    wt_ref: (IN, OUT)  weight, pre-transposed (no lane padding)
    b_ref : (1, OUT)   bias row
    o_ref : (TB, OUT)  output tile (narrow masked stores; hidden under DMA)
    """
    in_features = x_ref.shape[1]
    x = x_ref[...].astype(jnp.float32)
    # Start from the bias row; it broadcasts over the batch tile on the first add.
    y = b_ref[...].astype(jnp.float32)
    # IN is tiny (2): static unroll -> two broadcast FMAs on the VPU, no MXU/XLU.
    for k in range(in_features):
        y = y + x[:, k:k + 1] * wt_ref[k:k + 1, :].astype(jnp.float32)
    o_ref[...] = y.astype(o_ref.dtype)


def prepare_linear_params(weight, bias):
    """One-off layout prep (do this at parameter init, not per forward).

    weight: (OUT, IN) torch-convention -> wt: (IN, OUT); bias: (OUT,) -> (1, OUT).
    """
    return weight.T, bias[None, :]


def linear_forward(x, wt, b2, *, block_b=2048):
    """torch.nn.Linear forward: y = x @ W^T + b, with wt = W^T already (IN, OUT)."""
    B, IN = x.shape
    OUT = wt.shape[1]
    assert wt.shape[0] == IN
    assert b2.shape == (1, OUT)
    assert block_b % SUBLANES == 0

    # TODO(synk): for genuinely small B a plain fused XLA `x @ wt + b2` (no
    # custom-call boundary) is fastest; the Pallas path is kept so the kernel
    # covers all batch sizes.
    if B <= SMALL_B:
        # Single whole-array block: tb == B == full dim satisfies the (8,128) rule.
        tb = B
    else:
        # At least 2 grid steps so v7x's two TensorCores both take batch tiles;
        # cap at block_b (sweepable).  tb is a multiple of 8.
        tb = min(block_b, max(SUBLANES, _round_up(pl.cdiv(B, 2), SUBLANES)))

    grid = (pl.cdiv(B, tb),)
    return pl.pallas_call(
        _linear_vpu_kernel,
        out_shape=jax.ShapeDtypeStruct((B, OUT), x.dtype),
        grid=grid,
        in_specs=[
            pl.BlockSpec((tb, IN), lambda i: (i, 0)),
            pl.BlockSpec((IN, OUT), lambda i: (0, 0)),   # VMEM-resident across grid
            pl.BlockSpec((1, OUT), lambda i: (0, 0)),
        ],
        out_specs=pl.BlockSpec((tb, OUT), lambda i: (i, 0)),
        compiler_params=pltpu.CompilerParams(
            # Batch tiles are independent: lets megacore (v7x 2 TCs) split them.
            dimension_semantics=("parallel",),
        ),
    )(x, wt, b2)


if __name__ == "__main__":
    key = jax.random.PRNGKey(0)
    k_x, k_w, k_b, k_x2 = jax.random.split(key, 4)

    IN, OUT = 2, 2

    # Deterministic parameter init mimicking torch.nn.Linear default:
    # uniform(-1/sqrt(in_features), 1/sqrt(in_features))
    bound = 1.0 / jnp.sqrt(jnp.float32(IN))
    weight = jax.random.uniform(k_w, (OUT, IN), jnp.float32, -bound, bound)
    bias = jax.random.uniform(k_b, (OUT,), jnp.float32, -bound, bound)

    # One-off layout prep (hoisted out of the forward).
    wt, b2 = prepare_linear_params(weight, bias)
    wt = jax.block_until_ready(wt)
    b2 = jax.block_until_ready(b2)

    # Small batch (typical use of this torch module) -> single-block path.
    B_small = 8
    x_small = jax.random.normal(k_x, (B_small, IN), jnp.float32)
    out_small = jax.block_until_ready(linear_forward(x_small, wt, b2))
    ref_small = x_small @ weight.T + bias
    assert out_small.shape == (B_small, OUT)
    assert jnp.allclose(out_small, ref_small, atol=1e-5, rtol=1e-5)

    # Larger batch exercises the B-tiled "parallel" path with a ragged last
    # block (no host-side pad, no post-slice).
    B_big = 2307
    x_big = jax.random.normal(k_x2, (B_big, IN), jnp.float32)
    out_big = jax.block_until_ready(linear_forward(x_big, wt, b2, block_b=512))
    ref_big = x_big @ weight.T + bias
    assert out_big.shape == (B_big, OUT)
    assert jnp.allclose(out_big, ref_big, atol=1e-5, rtol=1e-5)

    print("KERNEL_OK")
</pallas_src>

<mosaic_0001>
module attributes {stable_mosaic.version = 11 : i64} {
  func.func @_linear_vpu_kernel(%arg0: i32, %arg1: memref<8x2xf32, #tpu.memory_space<vmem>>, %arg2: memref<2x2xf32, #tpu.memory_space<vmem>>, %arg3: memref<1x2xf32, #tpu.memory_space<vmem>>, %arg4: memref<8x2xf32, #tpu.memory_space<vmem>>) attributes {dimension_semantics = [#tpu.dimension_semantics<parallel>], iteration_bounds = array<i64: 1>, scalar_prefetch = 0 : i64, scratch_operands = 0 : i64, tpu.core_type = #tpu.core_type<tc>, window_params = [{transform_indices = @transform_0, window_bounds = array<i64: 8, 2>}, {pipeline_mode = #tpu.pipeline_mode<synchronous>, transform_indices = @transform_1, window_bounds = array<i64: 2, 2>}, {pipeline_mode = #tpu.pipeline_mode<synchronous>, transform_indices = @transform_2, window_bounds = array<i64: 1, 2>}, {transform_indices = @transform_3, window_bounds = array<i64: 8, 2>}]} {
    %c0 = arith.constant 0 : index
    %c0_0 = arith.constant 0 : index
    %0 = vector.load %arg1[%c0, %c0_0] : memref<8x2xf32, #tpu.memory_space<vmem>>, vector<8x2xf32>
    %c0_1 = arith.constant 0 : index
    %c0_2 = arith.constant 0 : index
    %1 = vector.load %arg3[%c0_1, %c0_2] : memref<1x2xf32, #tpu.memory_space<vmem>>, vector<1x2xf32>
    %2 = vector.extract_strided_slice %0 {offsets = [0, 0], sizes = [8, 1], strides = [1, 1]} : vector<8x2xf32> to vector<8x1xf32>
    %c0_3 = arith.constant 0 : index
    %c0_4 = arith.constant 0 : index
    %3 = vector.load %arg2[%c0_3, %c0_4] : memref<2x2xf32, #tpu.memory_space<vmem>>, vector<1x2xf32>
    %4 = vector.broadcast %2 : vector<8x1xf32> to vector<8x2xf32>
    %5 = vector.broadcast %3 : vector<1x2xf32> to vector<8x2xf32>
    %6 = arith.mulf %4, %5 : vector<8x2xf32>
    %7 = vector.broadcast %1 : vector<1x2xf32> to vector<8x2xf32>
    %8 = arith.addf %7, %6 : vector<8x2xf32>
    %9 = vector.extract_strided_slice %0 {offsets = [0, 1], sizes = [8, 1], strides = [1, 1]} : vector<8x2xf32> to vector<8x1xf32>
    %c1 = arith.constant 1 : index
    %c0_5 = arith.constant 0 : index
    %10 = vector.load %arg2[%c1, %c0_5] : memref<2x2xf32, #tpu.memory_space<vmem>>, vector<1x2xf32>
    %11 = vector.broadcast %9 : vector<8x1xf32> to vector<8x2xf32>
    %12 = vector.broadcast %10 : vector<1x2xf32> to vector<8x2xf32>
    %13 = arith.mulf %11, %12 : vector<8x2xf32>
    %14 = arith.addf %8, %13 : vector<8x2xf32>
    %c0_6 = arith.constant 0 : index
    %c0_7 = arith.constant 0 : index
    %15 = vector.load %arg4[%c0_6, %c0_7] : memref<8x2xf32, #tpu.memory_space<vmem>>, vector<8x2xf32>
    tpu.vector_store %arg4[%c0_6, %c0_7], %14 {strides = array<i32>} : memref<8x2xf32, #tpu.memory_space<vmem>>, vector<8x2xf32>,
    return
  }
  func.func @transform_0(%arg0: i32) -> (i32, i32) {
    %c0_i32 = arith.constant 0 : i32
    %c0_i32_0 = arith.constant 0 : i32
    return %arg0, %c0_i32 : i32, i32
  }
  func.func @transform_1(%arg0: i32) -> (i32, i32) {
    %c0_i32 = arith.constant 0 : i32
    %c0_i32_0 = arith.constant 0 : i32
    %c0_i32_1 = arith.constant 0 : i32
    return %c0_i32, %c0_i32_0 : i32, i32
  }
  func.func @transform_2(%arg0: i32) -> (i32, i32) {
    %c0_i32 = arith.constant 0 : i32
    %c0_i32_0 = arith.constant 0 : i32
    %c0_i32_1 = arith.constant 0 : i32
    return %c0_i32, %c0_i32_0 : i32, i32
  }
  func.func @transform_3(%arg0: i32) -> (i32, i32) {
    %c0_i32 = arith.constant 0 : i32
    %c0_i32_0 = arith.constant 0 : i32
    return %arg0, %c0_i32 : i32, i32
  }
}

</mosaic_0001>

<bundles_post_ra>
// kernel: tpu_custom_call.1
= control target key start
LH: loop header
LB: loop body
LE: loop exit
PB: predicated region body
PF: predicated region fallthrough
CT: control target
= control target key end

     0   :  { %v58_v0 = vmov 0   ;;  %v59_v2 = vmov 1   ;;  %vm45_vm0 = vcmask 15360   ;;  %s95_s0 = inlined_call_operand.vmem [shape: f32[8,2], index: 0, kind: input, shape index: {}]   ;;  %s96_s1 = inlined_call_operand.vmem [shape: f32[2,2], index: 1, kind: input, shape index: {}]   ;;  %s97_s2 = inlined_call_operand.vmem [shape: f32[1,2], index: 2, kind: input, shape index: {}]   ;;  %s98_s3 = inlined_call_operand.vmem [shape: f32[8,2], index: 3, kind: output, shape index: {}]  }
   0x1   :  { %56 = vset.pattern.permute.xlu0 %v58_v0  ;;  %v14_v1 = vld [vmem:[%s95_s0] sm:$0xff] }
   0x2   :  { %19 = vperm.xlu0 %56, %v14_v1   ;;  %v51_v3 = vld [vmem:[%s96_s1] ss:$0 sm:$0xff]  ;;  %v53_v7 = vld [vmem:[%s96_s1 + $0x1] ss:$0 sm:$0xff] }
   0x3   :  { %v52_v6 = vld [vmem:[%s97_s2] ss:$0 sm:$0xff] }
   0x6   :  { %57 = vset.pattern.permute.xlu0 %v59_v2 }
   0x7   :  { %36 = vperm.xlu0 %57, %v14_v1  }
  0x81   :  { %v20_v4 = vpop.permute.xlu0 %19 }
  0x82   :  { %v26_v5 = vmul.f32 %v51_v3, %v20_v4 }
  0x84   :  { %v33_v9 = vadd.f32 %v52_v6, %v26_v5 }
  0x86   :  { %v37_v8 = vpop.permute.xlu0 %36 }
  0x87   :  { %v43_v10 = vmul.f32 %v53_v7, %v37_v8 }
  0x89   :  { %v44_v11 = vadd.f32 %v43_v10, %v33_v9 }
  0x8b   :  { %46 = vst.msk [vmem:[%s98_s3] sm:$0xff] %vm45_vm0, %v44_v11 }

</bundles_post_ra>
